<compile_context>
chip_gen: v5e
topology: v5e:2x2
jax: 0.10.0
libtpu: 0.0.40
codegen_flags: <defaults>
</compile_context>

<pallas_src>
import functools

import jax
import jax.numpy as jnp
from jax.experimental import pallas as pl
from jax.experimental.pallas import tpu as pltpu


# MXU operand dtype. bf16 is native on all three generations' MXUs and halves
# HBM->VMEM bytes for the largest operands (A, X, W). Accumulation and all
# elementwise math stay f32. Set to jnp.float32 for bit-level agreement with
# the f32 reference (then tighten the tolerance back to 1e-4).
MXU_DTYPE = jnp.bfloat16

_VMEM = pl.BlockSpec(memory_space=pltpu.MemorySpace.VMEM)


# ----------------------------- fused Pallas kernel -----------------------------

def fused_gin_kernel(a_ref, x_ref, w_ref, b_ref, out_ref, *,
                     layer_counts, eps, d0, dh):
    """Entire ModelGraphIsomorphism forward in one kernel (whole arrays in VMEM).

    a_ref : (K, N, N)   MXU_DTYPE   stacked dense weighted adjacency
    x_ref : (K, N, D0)  MXU_DTYPE   stacked node embeddings
    w_ref : (R_w, Dh)   MXU_DTYPE   per GIN: [W_0 (D0,Dh), W_1..W_{L-1} (Dh,Dh),
                                              Wr (L*Dh, Dh)] stacked on rows
    b_ref : (R_b, Dh)   f32         per GIN: [b_0..b_{L-1}, br, wf_row_k] rows,
                                    then one final row holding bf (broadcast)
    out   : (N, 128)    f32         lane-dense score tile (column 0 = score)
    """
    n = out_ref.shape[0]
    bias = b_ref[...]                                   # (R_b, Dh) f32

    score = jnp.zeros((n, 1), jnp.float32)
    w_off = 0
    b_off = 0
    for k, lcount in enumerate(layer_counts):
        a = a_ref[k]                                    # (N, N)  MXU operand
        h_m = x_ref[k]                                  # (N, D0) MXU operand
        h_f = None                                      # f32 copy (lazy)
        wr_off = w_off + d0 + (lcount - 1) * dh         # readout weight rows
        readout = jnp.zeros((n, dh), jnp.float32)

        d_in = d0
        for l in range(lcount):
            w = w_ref[w_off:w_off + d_in, :]            # (d_in, Dh)
            w_off += d_in
            b = bias[b_off:b_off + 1, :]                # (1, Dh) f32
            b_off += 1

            if d_in > dh:
                # Reassociated GINConv: project first, then aggregate.
                #   ((1+eps)h + A h) W == (1+eps)(hW) + A (hW)
                hp = jnp.dot(h_m, w, preferred_element_type=jnp.float32)
                agg = jnp.dot(a, hp.astype(MXU_DTYPE),
                              preferred_element_type=jnp.float32)
                y = (1.0 + eps) * hp + agg + b          # f32 VPU math
            else:
                if h_f is None:
                    h_f = h_m.astype(jnp.float32)
                agg = jnp.dot(a, h_m, preferred_element_type=jnp.float32)
                z = (1.0 + eps) * h_f + agg             # f32 VPU math
                y = jnp.dot(z.astype(MXU_DTYPE), w,
                            preferred_element_type=jnp.float32) + b

            h_f = jnp.maximum(y, 0.0)                   # ReLU in f32
            h_m = h_f.astype(MXU_DTYPE)

            # Incremental readout accumulation (the nn.ReLU() before the
            # readout Linear is the identity: h_l >= 0 already).
            wr_l = w_ref[wr_off + l * dh: wr_off + (l + 1) * dh, :]
            readout = readout + jnp.dot(h_m, wr_l,
                                        preferred_element_type=jnp.float32)
            d_in = dh

        w_off = wr_off + lcount * dh
        br = bias[b_off:b_off + 1, :]; b_off += 1       # (1, Dh)
        wf_row = bias[b_off:b_off + 1, :]; b_off += 1   # (1, Dh)
        readout = readout + br

        # Lane-dense fuse: VPU multiply + cross-lane reduce instead of an
        # (N,Dh)x(Dh,1) matmul with a 1-wide MXU output.
        score = score + jnp.sum(readout * wf_row, axis=-1, keepdims=True)

    bf = bias[b_off:b_off + 1, 0:1]                     # (1, 1)
    # Lane-dense (N, 128) output tile -> unmasked vst; wrapper slices column 0.
    out_ref[...] = jnp.broadcast_to(score + bf, out_ref.shape)


# ----------------------------- parameter handling ------------------------------

def init_params(key, *, bert_hidden, gin_hidden, gin_layer):
    """Deterministic parameter init matching the module's shapes (f32)."""
    params = {"gins": [], "fuse": None}
    for layer_count in gin_layer:
        key, *ks = jax.random.split(key, 2 * layer_count + 3)
        layers = []
        for l in range(layer_count):
            d_in = bert_hidden if l == 0 else gin_hidden
            w = 0.05 * jax.random.normal(ks[2 * l], (d_in, gin_hidden), jnp.float32)
            b = 0.05 * jax.random.normal(ks[2 * l + 1], (1, gin_hidden), jnp.float32)
            layers.append((w, b))
        wr = 0.05 * jax.random.normal(ks[-2], (layer_count * gin_hidden, gin_hidden),
                                      jnp.float32)
        br = 0.05 * jax.random.normal(ks[-1], (1, gin_hidden), jnp.float32)
        params["gins"].append({"layers": layers, "readout": (wr, br)})
    key, kf1, kf2 = jax.random.split(key, 3)
    wf = 0.05 * jax.random.normal(kf1, (len(gin_layer) * gin_hidden, 1), jnp.float32)
    bf = 0.05 * jax.random.normal(kf2, (1, 1), jnp.float32)
    params["fuse"] = (wf, bf)
    return params


def pack_params(params, *, gin_hidden):
    """Pack all weights into one (R_w, Dh) bf16 blob and all biases / fuse rows
    into one (R_b, Dh) f32 blob (done ONCE at init; no per-call casts)."""
    dh = gin_hidden
    k_count = len(params["gins"])
    wf, bf = params["fuse"]                       # (K*Dh, 1), (1, 1)
    wf_rows = wf.reshape(k_count, dh)             # row k multiplies readout_k

    w_rows, b_rows = [], []
    for k, gp in enumerate(params["gins"]):
        for (w, b) in gp["layers"]:
            w_rows.append(w)
            b_rows.append(b)
        wr, br = gp["readout"]
        w_rows.append(wr)
        b_rows.append(br)
        b_rows.append(wf_rows[k:k + 1, :])
    b_rows.append(jnp.broadcast_to(bf, (1, dh)))

    w_blob = jnp.concatenate(w_rows, axis=0).astype(MXU_DTYPE)
    bias_blob = jnp.concatenate(b_rows, axis=0).astype(jnp.float32)
    return w_blob, bias_blob


# ----------------------------- forward wrapper ------------------------------

@functools.partial(jax.jit, static_argnames=("layer_counts", "d0", "dh", "eps"))
def model_forward(a_stack, x_stack, w_blob, bias_blob, *, layer_counts, d0, dh, eps):
    n = int(x_stack.shape[1])

    kernel = functools.partial(fused_gin_kernel, layer_counts=layer_counts,
                               eps=float(eps), d0=d0, dh=dh)

    # Advisory cost estimate (reassociated first layer accounted for).
    flops = 0
    for lcount in layer_counts:
        d_in = d0
        for _ in range(lcount):
            if d_in > dh:
                flops += 2 * n * d_in * dh + 2 * n * n * dh
            else:
                flops += 2 * n * n * d_in + 2 * n * d_in * dh
            flops += 2 * n * dh * dh            # readout slice matmul
            d_in = dh
        flops += 2 * n * dh                      # fuse multiply + reduce

    total_bytes = (a_stack.size * a_stack.dtype.itemsize
                   + x_stack.size * x_stack.dtype.itemsize
                   + w_blob.size * w_blob.dtype.itemsize
                   + bias_blob.size * bias_blob.dtype.itemsize
                   + n * 128 * 4)
    # Whole-array residency: budget VMEM explicitly (v5e scoped default is only
    # 16 MiB; keep comfortably under v7x's 64 MiB physical).
    vmem_budget = int(min(100 * 2 ** 20, max(32 * 2 ** 20, 4 * total_bytes)))

    out = pl.pallas_call(
        kernel,
        out_shape=jax.ShapeDtypeStruct((n, 128), jnp.float32),
        in_specs=[_VMEM, _VMEM, _VMEM, _VMEM],
        out_specs=_VMEM,
        compiler_params=pltpu.CompilerParams(vmem_limit_bytes=vmem_budget),
        cost_estimate=pl.CostEstimate(flops=int(flops), transcendentals=0,
                                      bytes_accessed=int(total_bytes)),
    )(a_stack, x_stack, w_blob, bias_blob)

    score = out[:, :1]                           # lane-dense tile -> (N, 1)
    # TODO(synk): torch.argsort(descending=True) defaults to dim=-1 (size 1
    # here -> always zeros); confirm whether ranking across sentences (axis 0)
    # is the intended semantics.
    prediction = jnp.argsort(score, axis=-1, descending=True)
    return score, prediction


def reference_forward(graphs, params, eps):
    """Pure-JAX f32 reference for correctness checking."""
    readouts = []
    for k, (a, x) in enumerate(graphs):
        gin_p = params["gins"][k]
        h = x
        outs = []
        for (w, b) in gin_p["layers"]:
            h = jnp.maximum(((1.0 + eps) * h + a @ h) @ w + b, 0.0)
            outs.append(h)
        wr, br = gin_p["readout"]
        readouts.append(jnp.maximum(jnp.concatenate(outs, -1), 0.0) @ wr + br)
    wf, bf = params["fuse"]
    return jnp.concatenate(readouts, -1) @ wf + bf


# --------------------------------- main ------------------------------------

if __name__ == "__main__":
    # Small option consistent with the module. BERT_HIDDEN > GIN_HIDDEN so the
    # reassociated first-layer path is exercised.
    BERT_HIDDEN = 64
    GIN_HIDDEN = 32
    GIN_LAYER = (2, 2)      # two GINs, two GINConv layers each
    GIN_EPS = 0.0
    N = 8                   # nodes ("sentences") per graph

    key = jax.random.PRNGKey(0)
    key, kp = jax.random.split(key)
    params = init_params(kp, bert_hidden=BERT_HIDDEN, gin_hidden=GIN_HIDDEN,
                         gin_layer=GIN_LAYER)
    w_blob, bias_blob = pack_params(params, gin_hidden=GIN_HIDDEN)

    graphs = []
    for _ in GIN_LAYER:
        key, ka, km, kx = jax.random.split(key, 4)
        mask = (jax.random.uniform(km, (N, N)) < 0.4).astype(jnp.float32)
        weights = jax.random.uniform(ka, (N, N), jnp.float32)
        a = mask * weights                                # dense weighted adjacency
        x = jax.random.normal(kx, (N, BERT_HIDDEN), jnp.float32)
        graphs.append((a, x))

    # Pack graph operands once into lane-dense stacks in the MXU dtype.
    a_stack = jnp.stack([a for a, _ in graphs]).astype(MXU_DTYPE)
    x_stack = jnp.stack([x for _, x in graphs]).astype(MXU_DTYPE)

    score, prediction = model_forward(a_stack, x_stack, w_blob, bias_blob,
                                      layer_counts=GIN_LAYER, d0=BERT_HIDDEN,
                                      dh=GIN_HIDDEN, eps=GIN_EPS)
    jax.block_until_ready((score, prediction))

    ref = reference_forward(graphs, params, GIN_EPS)
    # bf16 MXU operands vs f32 reference -> loosened tolerance.
    assert jnp.allclose(score, ref, atol=2e-2, rtol=2e-2), "mismatch vs reference"
    assert score.shape == (N, 1) and prediction.shape == (N, 1)

    print("KERNEL_OK")
</pallas_src>

<mosaic_0001>
module attributes {stable_mosaic.version = 11 : i64} {
  func.func @fused_gin_kernel(%arg0: memref<2x8x8xbf16, #tpu.memory_space<vmem>>, %arg1: memref<2x8x64xbf16, #tpu.memory_space<vmem>>, %arg2: memref<320x32xbf16, #tpu.memory_space<vmem>>, %arg3: memref<9x32xf32, #tpu.memory_space<vmem>>, %arg4: memref<8x128xf32, #tpu.memory_space<vmem>>) attributes {dimension_semantics = [], scalar_prefetch = 0 : i64, scratch_operands = 0 : i64, tpu.core_type = #tpu.core_type<tc>} {
    %c0 = arith.constant 0 : index
    %c0_0 = arith.constant 0 : index
    %0 = vector.load %arg3[%c0, %c0_0] : memref<9x32xf32, #tpu.memory_space<vmem>>, vector<9x32xf32>
    %cst = arith.constant 0.000000e+00 : f32
    %1 = vector.broadcast %cst : f32 to vector<8x1xf32>
    %c0_1 = arith.constant 0 : index
    %c0_2 = arith.constant 0 : index
    %c0_3 = arith.constant 0 : index
    %2 = vector.load %arg0[%c0_1, %c0_2, %c0_3] : memref<2x8x8xbf16, #tpu.memory_space<vmem>>, vector<1x8x8xbf16>
    %3 = vector.shape_cast %2 : vector<1x8x8xbf16> to vector<8x8xbf16>
    %c0_4 = arith.constant 0 : index
    %c0_5 = arith.constant 0 : index
    %c0_6 = arith.constant 0 : index
    %4 = vector.load %arg1[%c0_4, %c0_5, %c0_6] : memref<2x8x64xbf16, #tpu.memory_space<vmem>>, vector<1x8x64xbf16>
    %5 = vector.shape_cast %4 : vector<1x8x64xbf16> to vector<8x64xbf16>
    %cst_7 = arith.constant 0.000000e+00 : f32
    %6 = vector.broadcast %cst_7 : f32 to vector<8x32xf32>
    %c0_8 = arith.constant 0 : index
    %c0_9 = arith.constant 0 : index
    %7 = vector.load %arg2[%c0_8, %c0_9] : memref<320x32xbf16, #tpu.memory_space<vmem>>, vector<64x32xbf16>
    %8 = vector.extract_strided_slice %0 {offsets = [0, 0], sizes = [1, 32], strides = [1, 1]} : vector<9x32xf32> to vector<1x32xf32>
    %cst_10 = arith.constant dense<0.000000e+00> : vector<8x32xf32>
    %9 = tpu.matmul %5, %7, %cst_10 {dimension_numbers = #tpu.dot_dimension_numbers<[1], [0], [0], [1], [0, 0, 1, 1], [], []>} : vector<8x64xbf16>, vector<64x32xbf16>, vector<8x32xf32> -> vector<8x32xf32>
    %10 = arith.truncf %9 : vector<8x32xf32> to vector<8x32xbf16>
    %cst_11 = arith.constant dense<0.000000e+00> : vector<8x32xf32>
    %11 = tpu.matmul %3, %10, %cst_11 {dimension_numbers = #tpu.dot_dimension_numbers<[1], [0], [0], [1], [0, 0, 1, 1], [], []>} : vector<8x8xbf16>, vector<8x32xbf16>, vector<8x32xf32> -> vector<8x32xf32>
    %cst_12 = arith.constant 1.000000e+00 : f32
    %12 = vector.broadcast %cst_12 : f32 to vector<8x32xf32>
    %13 = arith.mulf %12, %9 : vector<8x32xf32>
    %14 = arith.addf %13, %11 : vector<8x32xf32>
    %15 = vector.broadcast %8 : vector<1x32xf32> to vector<8x32xf32>
    %16 = arith.addf %14, %15 : vector<8x32xf32>
    %cst_13 = arith.constant 0.000000e+00 : f32
    %17 = vector.broadcast %cst_13 : f32 to vector<8x32xf32>
    %18 = arith.maximumf %16, %17 : vector<8x32xf32>
    %19 = arith.truncf %18 : vector<8x32xf32> to vector<8x32xbf16>
    %c96 = arith.constant 96 : index
    %c0_14 = arith.constant 0 : index
    %20 = vector.load %arg2[%c96, %c0_14] : memref<320x32xbf16, #tpu.memory_space<vmem>>, vector<32x32xbf16>
    %cst_15 = arith.constant dense<0.000000e+00> : vector<8x32xf32>
    %21 = tpu.matmul %19, %20, %cst_15 {dimension_numbers = #tpu.dot_dimension_numbers<[1], [0], [0], [1], [0, 0, 1, 1], [], []>} : vector<8x32xbf16>, vector<32x32xbf16>, vector<8x32xf32> -> vector<8x32xf32>
    %22 = arith.addf %6, %21 : vector<8x32xf32>
    %c64 = arith.constant 64 : index
    %c0_16 = arith.constant 0 : index
    %23 = vector.load %arg2[%c64, %c0_16] : memref<320x32xbf16, #tpu.memory_space<vmem>>, vector<32x32xbf16>
    %24 = vector.extract_strided_slice %0 {offsets = [1, 0], sizes = [1, 32], strides = [1, 1]} : vector<9x32xf32> to vector<1x32xf32>
    %cst_17 = arith.constant dense<0.000000e+00> : vector<8x32xf32>
    %25 = tpu.matmul %3, %19, %cst_17 {dimension_numbers = #tpu.dot_dimension_numbers<[1], [0], [0], [1], [0, 0, 1, 1], [], []>} : vector<8x8xbf16>, vector<8x32xbf16>, vector<8x32xf32> -> vector<8x32xf32>
    %cst_18 = arith.constant 1.000000e+00 : f32
    %26 = vector.broadcast %cst_18 : f32 to vector<8x32xf32>
    %27 = arith.mulf %26, %18 : vector<8x32xf32>
    %28 = arith.addf %27, %25 : vector<8x32xf32>
    %29 = arith.truncf %28 : vector<8x32xf32> to vector<8x32xbf16>
    %cst_19 = arith.constant dense<0.000000e+00> : vector<8x32xf32>
    %30 = tpu.matmul %29, %23, %cst_19 {dimension_numbers = #tpu.dot_dimension_numbers<[1], [0], [0], [1], [0, 0, 1, 1], [], []>} : vector<8x32xbf16>, vector<32x32xbf16>, vector<8x32xf32> -> vector<8x32xf32>
    %31 = vector.broadcast %24 : vector<1x32xf32> to vector<8x32xf32>
    %32 = arith.addf %30, %31 : vector<8x32xf32>
    %cst_20 = arith.constant 0.000000e+00 : f32
    %33 = vector.broadcast %cst_20 : f32 to vector<8x32xf32>
    %34 = arith.maximumf %32, %33 : vector<8x32xf32>
    %35 = arith.truncf %34 : vector<8x32xf32> to vector<8x32xbf16>
    %c128 = arith.constant 128 : index
    %c0_21 = arith.constant 0 : index
    %36 = vector.load %arg2[%c128, %c0_21] : memref<320x32xbf16, #tpu.memory_space<vmem>>, vector<32x32xbf16>
    %cst_22 = arith.constant dense<0.000000e+00> : vector<8x32xf32>
    %37 = tpu.matmul %35, %36, %cst_22 {dimension_numbers = #tpu.dot_dimension_numbers<[1], [0], [0], [1], [0, 0, 1, 1], [], []>} : vector<8x32xbf16>, vector<32x32xbf16>, vector<8x32xf32> -> vector<8x32xf32>
    %38 = arith.addf %22, %37 : vector<8x32xf32>
    %39 = vector.extract_strided_slice %0 {offsets = [2, 0], sizes = [1, 32], strides = [1, 1]} : vector<9x32xf32> to vector<1x32xf32>
    %40 = vector.extract_strided_slice %0 {offsets = [3, 0], sizes = [1, 32], strides = [1, 1]} : vector<9x32xf32> to vector<1x32xf32>
    %41 = vector.broadcast %39 : vector<1x32xf32> to vector<8x32xf32>
    %42 = arith.addf %38, %41 : vector<8x32xf32>
    %43 = vector.broadcast %40 : vector<1x32xf32> to vector<8x32xf32>
    %44 = arith.mulf %42, %43 : vector<8x32xf32>
    %cst_23 = arith.constant dense<0.000000e+00> : vector<8xf32>
    %45 = vector.multi_reduction <add>, %44, %cst_23 [1] : vector<8x32xf32> to vector<8xf32>
    %46 = vector.shape_cast %45 : vector<8xf32> to vector<8x1xf32>
    %47 = arith.addf %1, %46 : vector<8x1xf32>
    %c1 = arith.constant 1 : index
    %c0_24 = arith.constant 0 : index
    %c0_25 = arith.constant 0 : index
    %48 = vector.load %arg0[%c1, %c0_24, %c0_25] : memref<2x8x8xbf16, #tpu.memory_space<vmem>>, vector<1x8x8xbf16>
    %49 = vector.shape_cast %48 : vector<1x8x8xbf16> to vector<8x8xbf16>
    %c1_26 = arith.constant 1 : index
    %c0_27 = arith.constant 0 : index
    %c0_28 = arith.constant 0 : index
    %50 = vector.load %arg1[%c1_26, %c0_27, %c0_28] : memref<2x8x64xbf16, #tpu.memory_space<vmem>>, vector<1x8x64xbf16>
    %51 = vector.shape_cast %50 : vector<1x8x64xbf16> to vector<8x64xbf16>
    %cst_29 = arith.constant 0.000000e+00 : f32
    %52 = vector.broadcast %cst_29 : f32 to vector<8x32xf32>
    %c160 = arith.constant 160 : index
    %c0_30 = arith.constant 0 : index
    %53 = vector.load %arg2[%c160, %c0_30] : memref<320x32xbf16, #tpu.memory_space<vmem>>, vector<64x32xbf16>
    %54 = vector.extract_strided_slice %0 {offsets = [4, 0], sizes = [1, 32], strides = [1, 1]} : vector<9x32xf32> to vector<1x32xf32>
    %cst_31 = arith.constant dense<0.000000e+00> : vector<8x32xf32>
    %55 = tpu.matmul %51, %53, %cst_31 {dimension_numbers = #tpu.dot_dimension_numbers<[1], [0], [0], [1], [0, 0, 1, 1], [], []>} : vector<8x64xbf16>, vector<64x32xbf16>, vector<8x32xf32> -> vector<8x32xf32>
    %56 = arith.truncf %55 : vector<8x32xf32> to vector<8x32xbf16>
    %cst_32 = arith.constant dense<0.000000e+00> : vector<8x32xf32>
    %57 = tpu.matmul %49, %56, %cst_32 {dimension_numbers = #tpu.dot_dimension_numbers<[1], [0], [0], [1], [0, 0, 1, 1], [], []>} : vector<8x8xbf16>, vector<8x32xbf16>, vector<8x32xf32> -> vector<8x32xf32>
    %cst_33 = arith.constant 1.000000e+00 : f32
    %58 = vector.broadcast %cst_33 : f32 to vector<8x32xf32>
    %59 = arith.mulf %58, %55 : vector<8x32xf32>
    %60 = arith.addf %59, %57 : vector<8x32xf32>
    %61 = vector.broadcast %54 : vector<1x32xf32> to vector<8x32xf32>
    %62 = arith.addf %60, %61 : vector<8x32xf32>
    %cst_34 = arith.constant 0.000000e+00 : f32
    %63 = vector.broadcast %cst_34 : f32 to vector<8x32xf32>
    %64 = arith.maximumf %62, %63 : vector<8x32xf32>
    %65 = arith.truncf %64 : vector<8x32xf32> to vector<8x32xbf16>
    %c256 = arith.constant 256 : index
    %c0_35 = arith.constant 0 : index
    %66 = vector.load %arg2[%c256, %c0_35] : memref<320x32xbf16, #tpu.memory_space<vmem>>, vector<32x32xbf16>
    %cst_36 = arith.constant dense<0.000000e+00> : vector<8x32xf32>
    %67 = tpu.matmul %65, %66, %cst_36 {dimension_numbers = #tpu.dot_dimension_numbers<[1], [0], [0], [1], [0, 0, 1, 1], [], []>} : vector<8x32xbf16>, vector<32x32xbf16>, vector<8x32xf32> -> vector<8x32xf32>
    %68 = arith.addf %52, %67 : vector<8x32xf32>
    %c224 = arith.constant 224 : index
    %c0_37 = arith.constant 0 : index
    %69 = vector.load %arg2[%c224, %c0_37] : memref<320x32xbf16, #tpu.memory_space<vmem>>, vector<32x32xbf16>
    %70 = vector.extract_strided_slice %0 {offsets = [5, 0], sizes = [1, 32], strides = [1, 1]} : vector<9x32xf32> to vector<1x32xf32>
    %cst_38 = arith.constant dense<0.000000e+00> : vector<8x32xf32>
    %71 = tpu.matmul %49, %65, %cst_38 {dimension_numbers = #tpu.dot_dimension_numbers<[1], [0], [0], [1], [0, 0, 1, 1], [], []>} : vector<8x8xbf16>, vector<8x32xbf16>, vector<8x32xf32> -> vector<8x32xf32>
    %cst_39 = arith.constant 1.000000e+00 : f32
    %72 = vector.broadcast %cst_39 : f32 to vector<8x32xf32>
    %73 = arith.mulf %72, %64 : vector<8x32xf32>
    %74 = arith.addf %73, %71 : vector<8x32xf32>
    %75 = arith.truncf %74 : vector<8x32xf32> to vector<8x32xbf16>
    %cst_40 = arith.constant dense<0.000000e+00> : vector<8x32xf32>
    %76 = tpu.matmul %75, %69, %cst_40 {dimension_numbers = #tpu.dot_dimension_numbers<[1], [0], [0], [1], [0, 0, 1, 1], [], []>} : vector<8x32xbf16>, vector<32x32xbf16>, vector<8x32xf32> -> vector<8x32xf32>
    %77 = vector.broadcast %70 : vector<1x32xf32> to vector<8x32xf32>
    %78 = arith.addf %76, %77 : vector<8x32xf32>
    %cst_41 = arith.constant 0.000000e+00 : f32
    %79 = vector.broadcast %cst_41 : f32 to vector<8x32xf32>
    %80 = arith.maximumf %78, %79 : vector<8x32xf32>
    %81 = arith.truncf %80 : vector<8x32xf32> to vector<8x32xbf16>
    %c288 = arith.constant 288 : index
    %c0_42 = arith.constant 0 : index
    %82 = vector.load %arg2[%c288, %c0_42] : memref<320x32xbf16, #tpu.memory_space<vmem>>, vector<32x32xbf16>
    %cst_43 = arith.constant dense<0.000000e+00> : vector<8x32xf32>
    %83 = tpu.matmul %81, %82, %cst_43 {dimension_numbers = #tpu.dot_dimension_numbers<[1], [0], [0], [1], [0, 0, 1, 1], [], []>} : vector<8x32xbf16>, vector<32x32xbf16>, vector<8x32xf32> -> vector<8x32xf32>
    %84 = arith.addf %68, %83 : vector<8x32xf32>
    %85 = vector.extract_strided_slice %0 {offsets = [6, 0], sizes = [1, 32], strides = [1, 1]} : vector<9x32xf32> to vector<1x32xf32>
    %86 = vector.extract_strided_slice %0 {offsets = [7, 0], sizes = [1, 32], strides = [1, 1]} : vector<9x32xf32> to vector<1x32xf32>
    %87 = vector.broadcast %85 : vector<1x32xf32> to vector<8x32xf32>
    %88 = arith.addf %84, %87 : vector<8x32xf32>
    %89 = vector.broadcast %86 : vector<1x32xf32> to vector<8x32xf32>
    %90 = arith.mulf %88, %89 : vector<8x32xf32>
    %cst_44 = arith.constant dense<0.000000e+00> : vector<8xf32>
    %91 = vector.multi_reduction <add>, %90, %cst_44 [1] : vector<8x32xf32> to vector<8xf32>
    %92 = vector.shape_cast %91 : vector<8xf32> to vector<8x1xf32>
    %93 = arith.addf %47, %92 : vector<8x1xf32>
    %94 = vector.extract_strided_slice %0 {offsets = [8, 0], sizes = [1, 1], strides = [1, 1]} : vector<9x32xf32> to vector<1x1xf32>
    %95 = vector.broadcast %94 : vector<1x1xf32> to vector<8x1xf32>
    %96 = arith.addf %93, %95 : vector<8x1xf32>
    %97 = vector.shape_cast %96 : vector<8x1xf32> to vector<8x1xf32>
    %98 = vector.broadcast %97 : vector<8x1xf32> to vector<8x128xf32>
    %c0_45 = arith.constant 0 : index
    %c0_46 = arith.constant 0 : index
    %99 = vector.load %arg4[%c0_45, %c0_46] : memref<8x128xf32, #tpu.memory_space<vmem>>, vector<8x128xf32>
    tpu.vector_store %arg4[%c0_45, %c0_46], %98 {strides = array<i32>} : memref<8x128xf32, #tpu.memory_space<vmem>>, vector<8x128xf32>,
    return
  }
}

</mosaic_0001>

<bundles_post_ra>
// kernel: model_forward.1
= control target key start
LH: loop header
LB: loop body
LE: loop exit
PB: predicated region body
PF: predicated region fallthrough
CT: control target
= control target key end

     0   :  { %vm54_vm0 = vcmask 523264   ;;  %vm76_vm1 = vcmask 1043456   ;;  %vm72_vm2 = vcmask 64512   ;;  %vm137_vm3 = vcmask 261120   ;;  %s689_s2 = inlined_call_operand.vmem [shape: bf16[320,32], index: 2, kind: input, shape index: {}]   ;;  %s690_s1 = inlined_call_operand.vmem [shape: bf16[2,8,64], index: 1, kind: input, shape index: {}]   ;;  %s691_s3 = inlined_call_operand.vmem [shape: f32[9,32], index: 3, kind: input, shape index: {}]   ;;  %s692_s0 = inlined_call_operand.vmem [shape: bf16[2,8,8], index: 0, kind: input, shape index: {}]   ;;  %s693_s4 = inlined_call_operand.vmem [shape: f32[8,128], index: 4, kind: output, shape index: {}]  }
   0x1   :  { %v533_v0 = vld [vmem:[%s689_s2 + $0x18] sm:$0xff]  ;;  %v532_v1 = vld [vmem:[%s689_s2 + $0x10] sm:$0xff]  ;;  %v531_v2 = vld [vmem:[%s689_s2 + $0x8] sm:$0xff] }
   0x2   :  { %62 = vmatpush.bf16.msra.mxu0 %v533_v0  ;;  %v530_v3 = vld [vmem:[%s689_s2] sm:$0xff]  ;;  %v537_v11 = vld [vmem:[%s689_s2 + $0x28] sm:$0xff]  ;;  %v535_v18 = vld [vmem:[%s689_s2 + $0x38] sm:$0xff] }
   0x3   :  { %v21_v4 = vld [vmem:[%s690_s1] sm:$0xf]  ;;  %147 = vmatpush.bf16.msra.mxu3 %v537_v11  ;;  %v534_v21 = vld [vmem:[%s689_s2 + $0x30] sm:$0xff]  ;;  %v543_v23 = vld [vmem:[%s689_s2 + $0x68] sm:$0xff] }
   0x4   :  { %v20_v8 = vld [vmem:[%s692_s0] sm:$0xf]  ;;  %v541_v25 = vld [vmem:[%s689_s2 + $0x58] sm:$0xff]  ;;  %v540_v26 = vld [vmem:[%s689_s2 + $0x50] sm:$0xff] }
   0x5   :  { %v604_v10 = vld [vmem:[%s691_s3] sm:$0xff]  ;;  %v539_v34 = vld [vmem:[%s689_s2 + $0x48] sm:$0xff]  ;;  %v548_v11 = vld [vmem:[%s689_s2 + $0x90] sm:$0xff] }
   0x6   :  { %63 = vmatpush.bf16.msra.mxu0 %v532_v1  ;;  %v94_v12 = vperm.slane %v604_v10, 0  ;;  %v536_v22 = vld [vmem:[%s689_s2 + $0x20] sm:$0xff]  ;;  %v124_v36 = vperm.slane %v604_v10, 1  ;;  %v545_v47 = vld [vmem:[%s689_s2 + $0x88] sm:$0xff]  ;;  %v215_v49 = vperm.slane %v604_v10, 2  ;;  %v217_v52 = vperm.slane %v604_v10, 3 }
   0x7   :  { %148 = vmatpush.bf16.msra.mxu3 %v536_v22  ;;  %v542_v24 = vld [vmem:[%s689_s2 + $0x60] sm:$0xff]  ;;  %v296_v57 = vperm.slane %v604_v10, 4  ;;  %v547_v1 = vld [vmem:[%s689_s2 + $0x78] sm:$0xff] }
   0x8   :  { %v483_v32 = vld [vmem:[%s690_s1 + $0x4] sm:$0xf] }
   0x9   :  { %v538_v35 = vld [vmem:[%s689_s2 + $0x40] sm:$0xff] }
   0xa   :  { %64 = vmatpush.bf16.msra.mxu0 %v531_v2  ;;  %v482_v45 = vld [vmem:[%s692_s0 + $0x4] sm:$0xf]  ;;  %v546_v2 = vld [vmem:[%s689_s2 + $0x70] sm:$0xff] }
   0xb   :  { %266 = vmatpush.bf16.msrb.mxu3 %v543_v23  ;;  %v544_v48 = vld [vmem:[%s689_s2 + $0x80] sm:$0xff] }
   0xe   :  { %65 = vmatpush.bf16.msra.mxu0 %v530_v3 }
   0xf   :  { %267 = vmatpush.bf16.msrb.mxu3 %v542_v24 }
  0x11   :  { %452 = vmatmul.msk.bf16.vlgmr.msra.gmra.mxu0 %vm54_vm0, %v21_v4 }
  0x13   :  { %268 = vmatpush.bf16.msrb.mxu3 %v541_v25 }
  0x17   :  { %269 = vmatpush.bf16.msrb.mxu3 %v540_v26  ;;  %v554_v26 = vmov 0  }
  0x18   :  { %551 = vset.pattern.permute.xlu1 %v554_v26  ;;  %552 = vset.pattern.permute.xlu0 %v554_v26 }
  0x8e   :  { %v67_v5 = vpop.f32.mrf.mxu0 }
  0x8f   :  { %v71_v6 = vpack.c.bf16 %v67_v5, %v67_v5 }
  0x91   :  { %v78_v7 = vsel %vm76_vm1, %v71_v6, 0 }
  0x92   :  { %87 = vmatpush.bf16.msra.mxu1 %v78_v7 }
  0x95   :  { %453 = vmatmul.msk.bf16.vlgmr.msra.gmra.mxu1 %vm72_vm2, %v20_v8 }
  0x96   :  { %v69_v9 = vpop.f32.mrf.mxu0  ;;  %181 = vmatpush.bf16.msrb.mxu1 %v539_v34 }
  0x97   :  { %v549_v9 = vld [vmem:[%s689_s2 + $0x98] sm:$0xff] }
  0x9a   :  { %182 = vmatpush.bf16.msrb.mxu1 %v538_v35 }
 0x112   :  { %v89_v13 = vpop.f32.mrf.mxu1 }
 0x113   :  { %v93_v14 = vadd.f32 %v89_v13, %v67_v5 }
 0x115   :  { %v95_v15 = vadd.f32 %v94_v12, %v93_v14  ;;  %v326_v12 = vperm.slane %v604_v10, 5 }
 0x117   :  { %v96_v16 = vmax.f32 %v95_v15, 0.0 }
 0x119   :  { %v97_v17 = vpack.c.bf16 %v96_v16, %v96_v16 }
 0x11a   :  { %v91_v19 = vpop.f32.mrf.mxu1 }
 0x11b   :  { %v107_v20 = vsel %vm76_vm1, %v97_v17, 0 }
 0x11c   :  { %116 = vmatpush.bf16.msra.mxu2 %v107_v20 }
 0x11f   :  { %454 = vmatmul.msk.bf16.vlgmr.msra.gmra.mxu2 %vm72_vm2, %v20_v8 }
 0x120   :  { %208 = vmatpush.bf16.msrb.mxu2 %v535_v18  ;;  %v416_v18 = vperm.slane %v604_v10, 6 }
 0x124   :  { %209 = vmatpush.bf16.msrb.mxu2 %v534_v21  ;;  %v418_v21 = vperm.slane %v604_v10, 7 }
 0x128   :  { %348 = vmatpush.bf16.msra.mxu2 %v547_v1 }
 0x12c   :  { %349 = vmatpush.bf16.msra.mxu2 %v546_v2 }
 0x12f   :  { %481 = vmatmul.msk.bf16.vlgmr.msrb.gmra.mxu2 %vm137_vm3, %v97_v17 }
 0x1a2   :  { %v118_v27 = vpop.f32.mrf.mxu2 }
 0x1a3   :  { %v122_v28 = vadd.f32 %v118_v27, %v96_v16 }
 0x1a5   :  { %v123_v29 = vpack.c.bf16 %v122_v28, %v122_v28  ;;  %v553_v28 = vld [vmem:[%s691_s3 + $0x8] ss:$0 sm:$0xff] }
 0x1a7   :  { %463 = vmatmul.msk.bf16.vlgmr.msra.gmra.mxu3 %vm137_vm3, %v123_v29 }
 0x1a8   :  { %382 = vmatpush.bf16.msra.mxu3 %v549_v9 }
 0x1aa   :  { %v120_v30 = vpop.f32.mrf.mxu2 }
 0x1ac   :  { %383 = vmatpush.bf16.msra.mxu3 %v548_v11 }
 0x1b2   :  { %v211_v31 = vpop.f32.mrf.mxu2 }
 0x1b7   :  { %500 = vmatmul.msk.bf16.vlgmr.msrb.gmra.mxu3 %vm54_vm0, %v483_v32 }
 0x1ba   :  { %v213_v33 = vpop.f32.mrf.mxu2 }
 0x22a   :  { %v150_v37 = vpop.f32.mrf.mxu3 }
 0x22b   :  { %v151_v38 = vadd.f32 %v150_v37, %v124_v36 }
 0x22d   :  { %v154_v39 = vmax.f32 %v151_v38, 0.0 }
 0x22f   :  { %v155_v40 = vpack.c.bf16 %v154_v39, %v154_v39 }
 0x231   :  { %472 = vmatmul.msk.bf16.vlgmr.msrb.gmra.mxu1 %vm137_vm3, %v155_v40 }
 0x232   :  { %v152_v41 = vpop.f32.mrf.mxu3 }
 0x23a   :  { %v271_v42 = vpop.f32.mrf.mxu3 }
 0x23b   :  { %v275_v43 = vpack.c.bf16 %v271_v42, %v271_v42 }
 0x23d   :  { %v280_v44 = vsel %vm76_vm1, %v275_v43, 0 }
 0x23e   :  { %289 = vmatpush.bf16.msrb.mxu0 %v280_v44 }
 0x241   :  { %501 = vmatmul.msk.bf16.vlgmr.msrb.gmra.mxu0 %vm72_vm2, %v482_v45 }
 0x242   :  { %v273_v46 = vpop.f32.mrf.mxu3  ;;  %409 = vmatpush.bf16.msra.mxu0 %v545_v47 }
 0x246   :  { %410 = vmatpush.bf16.msra.mxu0 %v544_v48 }
 0x2ae   :  { %v184_v50 = vpop.f32.mrf.mxu1 }
 0x2af   :  { %v212_v51 = vadd.f32 %v211_v31, %v184_v50 }
 0x2b1   :  { %v216_v53 = vadd.f32 %v215_v49, %v212_v51 }
 0x2b3   :  { %v218_v54 = vmul.f32 %v217_v52, %v216_v53 }
 0x2b5   :  { %v219_v55 = vsel %vm137_vm3, %v218_v54, 0.0 }
 0x2b6   :  { %220 = vadd.xlane.f32.xlu0 %v219_v55  ;;  %v186_v56 = vpop.f32.mrf.mxu1 }
 0x2be   :  { %v291_v58 = vpop.f32.mrf.mxu0 }
 0x2bf   :  { %v295_v59 = vadd.f32 %v291_v58, %v271_v42 }
 0x2c1   :  { %v297_v60 = vadd.f32 %v296_v57, %v295_v59 }
 0x2c3   :  { %v298_v61 = vmax.f32 %v297_v60, 0.0 }
 0x2c5   :  { %v299_v62 = vpack.c.bf16 %v298_v61, %v298_v61 }
 0x2c6   :  { %v293_v63 = vpop.f32.mrf.mxu0 }
 0x2c7   :  { %529 = vmatmul.msk.bf16.vlgmr.msra.gmra.mxu0 %vm137_vm3, %v299_v62  ;;  %v309_v0 = vsel %vm76_vm1, %v299_v62, 0 }
 0x2c8   :  { %318 = vmatpush.bf16.msra.mxu1 %v309_v0 }
 0x2cb   :  { %502 = vmatmul.msk.bf16.vlgmr.msra.gmra.mxu1 %vm72_vm2, %v482_v45 }
 0x329   :  { %v221_v27 = vpop.xlane.xlu0 %220 }
 0x344   :  { %v412_v3 = vpop.f32.mrf.mxu0 }
 0x348   :  { %v320_v4 = vpop.f32.mrf.mxu1 }
 0x349   :  { %v324_v5 = vadd.f32 %v320_v4, %v298_v61 }
 0x34b   :  { %v325_v6 = vpack.c.bf16 %v324_v5, %v324_v5 }
 0x34c   :  { %v414_v7 = vpop.f32.mrf.mxu0 }
 0x34d   :  { %511 = vmatmul.msk.bf16.vlgmr.msra.gmra.mxu2 %vm137_vm3, %v325_v6 }
 0x350   :  { %v322_v8 = vpop.f32.mrf.mxu1 }
 0x3d0   :  { %v351_v13 = vpop.f32.mrf.mxu2 }
 0x3d1   :  { %v352_v14 = vadd.f32 %v351_v13, %v326_v12 }
 0x3d3   :  { %v355_v15 = vmax.f32 %v352_v14, 0.0 }
 0x3d5   :  { %v356_v16 = vpack.c.bf16 %v355_v15, %v355_v15 }
 0x3d7   :  { %520 = vmatmul.msk.bf16.vlgmr.msra.gmra.mxu3 %vm137_vm3, %v356_v16 }
 0x3d8   :  { %v353_v17 = vpop.f32.mrf.mxu2 }
 0x45a   :  { %v385_v19 = vpop.f32.mrf.mxu3 }
 0x45b   :  { %v413_v20 = vadd.f32 %v412_v3, %v385_v19 }
 0x45d   :  { %v417_v22 = vadd.f32 %v416_v18, %v413_v20 }
 0x45f   :  { %v419_v23 = vmul.f32 %v418_v21, %v417_v22 }
 0x461   :  { %v420_v24 = vsel %vm137_vm3, %v419_v23, 0.0 }
 0x462   :  { %421 = vadd.xlane.f32.xlu0 %v420_v24  ;;  %v387_v25 = vpop.f32.mrf.mxu3 }
 0x4d5   :  { %v422_v29 = vpop.xlane.xlu0 %421 }
 0x4d6   :  { %v423_v30 = vadd.f32 %v422_v29, %v221_v27 }
 0x4d8   :  { %v425_v31 = vadd.f32 %v553_v28, %v423_v30 }
 0x4da   :  { %428 = vperm.xlu1 %551, %v425_v31  }
 0x54c   :  { %v429_v32 = vpop.permute.xlu1 %428 }
 0x54d   :  { %431 = vst [vmem:[%s693_s4] sm:$0xff] %v429_v32 }

</bundles_post_ra>
